<compile_context>
chip_gen: v6e
topology: v6e:2x2x1
jax: 0.10.0
libtpu: 0.0.40
codegen_flags: <defaults>
</compile_context>

<pallas_src>
import functools

import jax
import jax.numpy as jnp
from jax.experimental import pallas as pl
from jax.experimental.pallas import tpu as pltpu


def _mask_instance_loss_kernel(
    z_row_ref, z_col_ref, c_row_ref, c_col_ref,   # inputs
    out_ref,                                      # (1, T) per-row losses
    m_ref, l_ref, pos_ref,                        # (1, T) f32 scratch
    *, batch_size, temperature, tile, col_resident,
):
    N = 2 * batch_size
    T = tile
    n_col = N // T
    inv_temp = 1.0 / float(temperature)

    i = pl.program_id(0)   # row tile (parallel)
    j = pl.program_id(1)   # col tile (arbitrary, innermost)

    @pl.when(j == 0)
    def _init():
        m_ref[...] = jnp.full((1, T), -jnp.inf, jnp.float32)
        l_ref[...] = jnp.zeros((1, T), jnp.float32)
        pos_ref[...] = jnp.zeros((1, T), jnp.float32)

    z_r = z_row_ref[...]                       # (T, D)
    c_r = c_row_ref[...]                       # (T, C)
    if col_resident:
        off = pl.multiple_of(j * T, T)
        z_c = z_col_ref[pl.ds(off, T), :]      # (T, D) slice of resident z
        c_c = c_col_ref[pl.ds(off, T), :]      # (T, C) slice of resident c
    else:
        z_c = z_col_ref[...]
        c_c = c_col_ref[...]

    # Transposed Gram tiles: axis 0 (sublanes) = original column index,
    # axis 1 (lanes) = original row index.  Contraction on the last axis of
    # both operands -> no explicit transpose is materialized.
    dn = (((1,), (1,)), ((), ()))
    zz_t = jax.lax.dot_general(z_c, z_r, dn, preferred_element_type=jnp.float32)
    cc_t = jax.lax.dot_general(c_c, c_r, dn, preferred_element_type=jnp.float32)

    t_clamped = jnp.maximum(cc_t, jnp.float32(temperature))
    sim_t = zz_t * pl.reciprocal(t_clamped, approx=True)

    def accumulate(s):
        # Online logsumexp along the column (sublane) axis.
        m_prev = m_ref[...]
        m_new = jnp.maximum(m_prev, jnp.max(s, axis=0, keepdims=True))
        alpha = jnp.exp(m_prev - m_new)
        l_ref[...] = alpha * l_ref[...] + jnp.sum(
            jnp.exp(s - m_new), axis=0, keepdims=True)
        m_ref[...] = m_new

    # Tiles that can contain diagonal / partner entries (<= 2 per row tile).
    # The wrapper guarantees T | batch_size or T == N, so the partner band of
    # a row tile lives entirely inside one column tile.
    part_j = (i + (batch_size // T)) % n_col
    is_diag = i == j
    is_part = j == part_j
    is_edge = jnp.logical_or(is_diag, is_part)

    @pl.when(jnp.logical_not(is_edge))
    def _plain_tile():
        accumulate(sim_t)

    @pl.when(is_edge)
    def _edge_tile():
        rows = i * T + jax.lax.broadcasted_iota(jnp.int32, (T, T), 1)
        cols = j * T + jax.lax.broadcasted_iota(jnp.int32, (T, T), 0)
        partner = jnp.where(rows < batch_size,
                            rows + batch_size, rows - batch_size)
        pmask = cols == partner
        dmask = cols == rows
        # Partner entries use t_mask == temperature exactly.
        s = jnp.where(pmask, zz_t * jnp.float32(inv_temp), sim_t)
        # Positive term: exactly one entry per row, only present in this tile
        # (pmask is all-false on a pure diagonal tile, so this adds 0 there).
        pos_ref[...] += jnp.sum(jnp.where(pmask, zz_t, 0.0), axis=0,
                                keepdims=True) * jnp.float32(inv_temp)
        # Self-similarity is excluded from the logits.
        s = jnp.where(dmask, -jnp.inf, s)
        accumulate(s)

    @pl.when(j == n_col - 1)
    def _finalize():
        lse = m_ref[...] + jnp.log(l_ref[...])
        out_ref[...] = lse - pos_ref[...]


def _pick_tile(batch_size):
    """Tile T must divide batch_size (so a row tile's partner band sits in one
    column tile) or equal N (single-tile fallback for small / odd batches)."""
    N = 2 * batch_size
    for t in (256, 128):
        if N > t and batch_size % t == 0:
            return t
    # TODO(synk): batches not divisible by 128 fall back to a single (N, N)
    # tile; fine for small N, VMEM-limited for large unaligned batches.
    return N


def _vmem_limit_bytes(N, D, C, T, itemsize, col_resident):
    row_blocks = 2 * 2 * T * (D + C) * itemsize
    col_blocks = 2 * (N if col_resident else 2 * T) * (D + C) * itemsize
    tile_tmps = 8 * T * T * 4          # zz/cc/t/sim/exp f32 tile temporaries
    vectors = 32 * 8 * T * 4           # scratch, output, slack
    est = row_blocks + col_blocks + tile_tmps + vectors + (2 << 20)
    return int(min(max(est, 32 << 20), 120 << 20))


def mask_instance_loss(z_i, z_j, c_i, c_j, temperature,
                       compute_dtype=jnp.bfloat16):
    assert z_i.shape == z_j.shape and c_i.shape == c_j.shape
    batch_size = z_i.shape[0]
    N = 2 * batch_size

    # Only the concatenation / down-cast and the final mean live outside the
    # kernel.  bf16 operands run the MXU at native rate (f32 accumulate).
    z = jnp.concatenate([z_i, z_j], axis=0).astype(compute_dtype)   # (N, D)
    c = jnp.concatenate([c_i, c_j], axis=0).astype(compute_dtype)   # (N, C)
    D = z.shape[1]
    C = c.shape[1]

    T = _pick_tile(batch_size)
    n_tiles = N // T
    itemsize = jnp.dtype(compute_dtype).itemsize
    # z / c are tiny for realistic D, C: keep the column operands fully
    # resident in VMEM instead of re-fetching a column tile every grid step.
    col_resident = (N * (D + C) * itemsize) <= (4 << 20)

    if col_resident:
        z_col_spec = pl.BlockSpec((N, D), lambda i, j: (0, 0))
        c_col_spec = pl.BlockSpec((N, C), lambda i, j: (0, 0))
    else:
        z_col_spec = pl.BlockSpec((T, D), lambda i, j: (j, 0))
        c_col_spec = pl.BlockSpec((T, C), lambda i, j: (j, 0))

    kernel = functools.partial(
        _mask_instance_loss_kernel,
        batch_size=batch_size,
        temperature=float(temperature),
        tile=T,
        col_resident=col_resident,
    )

    grid_spec = pltpu.PrefetchScalarGridSpec(
        num_scalar_prefetch=0,
        grid=(n_tiles, n_tiles),
        in_specs=[
            pl.BlockSpec((T, D), lambda i, j: (i, 0)),   # z row block
            z_col_spec,                                   # z column source
            pl.BlockSpec((T, C), lambda i, j: (i, 0)),   # c row block
            c_col_spec,                                   # c column source
        ],
        out_specs=pl.BlockSpec((1, T), lambda i, j: (0, i)),
        scratch_shapes=[pltpu.VMEM((1, T), jnp.float32)] * 3,
    )

    per_row_loss = pl.pallas_call(
        kernel,
        out_shape=jax.ShapeDtypeStruct((1, N), jnp.float32),
        grid_spec=grid_spec,
        compiler_params=pltpu.CompilerParams(
            dimension_semantics=("parallel", "arbitrary"),
            vmem_limit_bytes=_vmem_limit_bytes(N, D, C, T, itemsize,
                                               col_resident),
        ),
    )(z, z, c, c)

    return jnp.sum(per_row_loss) / jnp.float32(N)


def _reference_loss(z_i, z_j, c_i, c_j, temperature,
                    compute_dtype=jnp.float32):
    """Pure-JAX reference mirroring the PyTorch forward; math in f32 on inputs
    rounded to `compute_dtype` (same rounding the kernel consumes)."""
    batch_size = z_i.shape[0]
    N = 2 * batch_size
    z = jnp.concatenate([z_i, z_j], 0).astype(compute_dtype).astype(jnp.float32)
    c = jnp.concatenate([c_i, c_j], 0).astype(compute_dtype).astype(jnp.float32)

    cc = c @ c.T
    t_mask = jnp.maximum(cc, temperature)
    idx = jnp.arange(batch_size)
    t_mask = t_mask.at[idx, idx + batch_size].set(temperature)
    t_mask = t_mask.at[idx + batch_size, idx].set(temperature)

    sim = (z @ z.T) / t_mask
    pos = jnp.concatenate(
        [jnp.diagonal(sim, batch_size), jnp.diagonal(sim, -batch_size)], axis=0)
    masked = jnp.where(jnp.eye(N, dtype=bool), -jnp.inf, sim)
    lse = jax.scipy.special.logsumexp(masked, axis=1)
    return jnp.sum(lse - pos) / N


if __name__ == "__main__":
    key = jax.random.PRNGKey(0)

    def make_inputs(key, batch, feat_dim, n_clusters):
        k1, k2, k3, k4 = jax.random.split(key, 4)
        z_i = jax.random.normal(k1, (batch, feat_dim), dtype=jnp.float32)
        z_j = jax.random.normal(k2, (batch, feat_dim), dtype=jnp.float32)
        c_i = jax.nn.softmax(
            jax.random.normal(k3, (batch, n_clusters), dtype=jnp.float32), -1)
        c_j = jax.nn.softmax(
            jax.random.normal(k4, (batch, n_clusters), dtype=jnp.float32), -1)
        return z_i, z_j, c_i, c_j

    temperature = 0.5
    k_small, k_big = jax.random.split(key)

    # Small case (batch=4 -> N=8): single (N, N) tile.
    args_small = make_inputs(k_small, batch=4, feat_dim=32, n_clusters=16)
    loss_small = jax.block_until_ready(
        mask_instance_loss(*args_small, temperature))
    ref_small = _reference_loss(*args_small, temperature,
                                compute_dtype=jnp.bfloat16)
    assert jnp.allclose(loss_small, ref_small, rtol=2e-2, atol=2e-2), (
        loss_small, ref_small)

    # Tiled case (batch=384 -> N=768, T=128 -> 6x6 grid): exercises plain,
    # diagonal and partner tiles plus the parallel row axis.
    args_big = make_inputs(k_big, batch=384, feat_dim=32, n_clusters=16)
    loss_big = jax.block_until_ready(
        mask_instance_loss(*args_big, temperature))
    ref_big = _reference_loss(*args_big, temperature,
                              compute_dtype=jnp.bfloat16)
    assert jnp.allclose(loss_big, ref_big, rtol=2e-2, atol=2e-2), (
        loss_big, ref_big)

    print("KERNEL_OK")
</pallas_src>

<mosaic_0001>
module attributes {stable_mosaic.version = 11 : i64} {
  func.func @_mask_instance_loss_kernel(%arg0: i32, %arg1: i32, %arg2: memref<8x32xbf16, #tpu.memory_space<vmem>>, %arg3: memref<8x32xbf16, #tpu.memory_space<vmem>>, %arg4: memref<8x16xbf16, #tpu.memory_space<vmem>>, %arg5: memref<8x16xbf16, #tpu.memory_space<vmem>>, %arg6: memref<1x8xf32, #tpu.memory_space<vmem>>, %arg7: memref<1x8xf32, #tpu.memory_space<vmem>>, %arg8: memref<1x8xf32, #tpu.memory_space<vmem>>, %arg9: memref<1x8xf32, #tpu.memory_space<vmem>>) attributes {dimension_semantics = [#tpu.dimension_semantics<parallel>, #tpu.dimension_semantics<arbitrary>], iteration_bounds = array<i64: 1, 1>, scalar_prefetch = 0 : i64, scratch_operands = 3 : i64, tpu.core_type = #tpu.core_type<tc>, window_params = [{transform_indices = @transform_0, window_bounds = array<i64: 8, 32>}, {pipeline_mode = #tpu.pipeline_mode<synchronous>, transform_indices = @transform_1, window_bounds = array<i64: 8, 32>}, {transform_indices = @transform_2, window_bounds = array<i64: 8, 16>}, {pipeline_mode = #tpu.pipeline_mode<synchronous>, transform_indices = @transform_3, window_bounds = array<i64: 8, 16>}, {transform_indices = @transform_4, window_bounds = array<i64: 1, 8>}]} {
    %c0_i32 = arith.constant 0 : i32
    %0 = arith.cmpi eq, %arg1, %c0_i32 : i32
    %1 = arith.extui %0 : i1 to i32
    %c0_i32_0 = arith.constant 0 : i32
    %2 = arith.cmpi ne, %1, %c0_i32_0 : i32
    scf.if %2 {
      %cst_18 = arith.constant 0xFF800000 : f32
      %39 = vector.broadcast %cst_18 : f32 to vector<1x8xf32>
      %c0_19 = arith.constant 0 : index
      %c0_20 = arith.constant 0 : index
      %40 = vector.load %arg7[%c0_19, %c0_20] : memref<1x8xf32, #tpu.memory_space<vmem>>, vector<1x8xf32>
      tpu.vector_store %arg7[%c0_19, %c0_20], %39 {strides = array<i32>} : memref<1x8xf32, #tpu.memory_space<vmem>>, vector<1x8xf32>,
      %cst_21 = arith.constant 0.000000e+00 : f32
      %41 = vector.broadcast %cst_21 : f32 to vector<1x8xf32>
      %c0_22 = arith.constant 0 : index
      %c0_23 = arith.constant 0 : index
      %42 = vector.load %arg8[%c0_22, %c0_23] : memref<1x8xf32, #tpu.memory_space<vmem>>, vector<1x8xf32>
      tpu.vector_store %arg8[%c0_22, %c0_23], %41 {strides = array<i32>} : memref<1x8xf32, #tpu.memory_space<vmem>>, vector<1x8xf32>,
      %cst_24 = arith.constant 0.000000e+00 : f32
      %43 = vector.broadcast %cst_24 : f32 to vector<1x8xf32>
      %c0_25 = arith.constant 0 : index
      %c0_26 = arith.constant 0 : index
      %44 = vector.load %arg9[%c0_25, %c0_26] : memref<1x8xf32, #tpu.memory_space<vmem>>, vector<1x8xf32>
      tpu.vector_store %arg9[%c0_25, %c0_26], %43 {strides = array<i32>} : memref<1x8xf32, #tpu.memory_space<vmem>>, vector<1x8xf32>,
    } else {
    }
    %c0 = arith.constant 0 : index
    %c0_1 = arith.constant 0 : index
    %3 = vector.load %arg2[%c0, %c0_1] : memref<8x32xbf16, #tpu.memory_space<vmem>>, vector<8x32xbf16>
    %c0_2 = arith.constant 0 : index
    %c0_3 = arith.constant 0 : index
    %4 = vector.load %arg4[%c0_2, %c0_3] : memref<8x16xbf16, #tpu.memory_space<vmem>>, vector<8x16xbf16>
    %c8_i32 = arith.constant 8 : i32
    %5 = arith.muli %arg1, %c8_i32 : i32
    %6 = tpu.assume_multiple %5, 8 : i32
    %7 = arith.index_cast %6 : i32 to index
    %c0_4 = arith.constant 0 : index
    %8 = vector.load %arg3[%7, %c0_4] : memref<8x32xbf16, #tpu.memory_space<vmem>>, vector<8x32xbf16>
    %9 = arith.index_cast %6 : i32 to index
    %c0_5 = arith.constant 0 : index
    %10 = vector.load %arg5[%9, %c0_5] : memref<8x16xbf16, #tpu.memory_space<vmem>>, vector<8x16xbf16>
    %cst = arith.constant dense<0.000000e+00> : vector<8x8xf32>
    %11 = tpu.matmul %8, %3, %cst {dimension_numbers = #tpu.dot_dimension_numbers<[1], [1], [0], [0], [0, 0, 1, 0], [], []>} : vector<8x32xbf16>, vector<8x32xbf16>, vector<8x8xf32> -> vector<8x8xf32>
    %cst_6 = arith.constant dense<0.000000e+00> : vector<8x8xf32>
    %12 = tpu.matmul %10, %4, %cst_6 {dimension_numbers = #tpu.dot_dimension_numbers<[1], [1], [0], [0], [0, 0, 1, 0], [], []>} : vector<8x16xbf16>, vector<8x16xbf16>, vector<8x8xf32> -> vector<8x8xf32>
    %cst_7 = arith.constant 5.000000e-01 : f32
    %13 = vector.broadcast %cst_7 : f32 to vector<8x8xf32>
    %14 = arith.maximumf %12, %13 : vector<8x8xf32>
    %15 = tpu.reciprocal %14 {approx = true} : vector<8x8xf32> -> vector<8x8xf32>
    %16 = arith.mulf %11, %15 : vector<8x8xf32>
    %c0_i32_8 = arith.constant 0 : i32
    %17 = arith.addi %arg0, %c0_i32_8 : i32
    %c1_i32 = arith.constant 1 : i32
    %c0_i32_9 = arith.constant 0 : i32
    %18 = arith.cmpi eq, %c1_i32, %c0_i32_9 : i32
    %c1_i32_10 = arith.constant 1 : i32
    %19 = arith.select %18, %c1_i32_10, %c1_i32 : i32
    %20 = arith.remsi %17, %19 : i32
    %c0_i32_11 = arith.constant 0 : i32
    %21 = arith.cmpi ne, %20, %c0_i32_11 : i32
    %c0_i32_12 = arith.constant 0 : i32
    %22 = arith.cmpi slt, %20, %c0_i32_12 : i32
    %c0_i32_13 = arith.constant 0 : i32
    %23 = arith.cmpi slt, %19, %c0_i32_13 : i32
    %24 = arith.xori %22, %23 : i1
    %25 = arith.andi %24, %21 : i1
    %26 = arith.addi %20, %19 : i32
    %27 = arith.select %25, %26, %20 : i32
    %28 = arith.cmpi eq, %arg0, %arg1 : i32
    %29 = arith.cmpi eq, %arg1, %27 : i32
    %30 = arith.ori %28, %29 : i1
    %true = arith.constant true
    %31 = arith.xori %30, %true : i1
    %32 = arith.extui %31 : i1 to i32
    %c0_i32_14 = arith.constant 0 : i32
    %33 = arith.cmpi ne, %32, %c0_i32_14 : i32
    scf.if %33 {
      %c0_18 = arith.constant 0 : index
      %c0_19 = arith.constant 0 : index
      %39 = vector.load %arg7[%c0_18, %c0_19] : memref<1x8xf32, #tpu.memory_space<vmem>>, vector<1x8xf32>
      %cst_20 = arith.constant dense<0xFF800000> : vector<8xf32>
      %40 = vector.multi_reduction <maximumf>, %16, %cst_20 [0] : vector<8x8xf32> to vector<8xf32>
      %41 = vector.shape_cast %40 : vector<8xf32> to vector<1x8xf32>
      %42 = arith.maximumf %39, %41 : vector<1x8xf32>
      %43 = arith.subf %39, %42 : vector<1x8xf32>
      %44 = math.exp %43 : vector<1x8xf32>
      %c0_21 = arith.constant 0 : index
      %c0_22 = arith.constant 0 : index
      %45 = vector.load %arg8[%c0_21, %c0_22] : memref<1x8xf32, #tpu.memory_space<vmem>>, vector<1x8xf32>
      %46 = arith.mulf %44, %45 : vector<1x8xf32>
      %47 = vector.broadcast %42 : vector<1x8xf32> to vector<8x8xf32>
      %48 = arith.subf %16, %47 : vector<8x8xf32>
      %49 = math.exp %48 : vector<8x8xf32>
      %cst_23 = arith.constant dense<0.000000e+00> : vector<8xf32>
      %50 = vector.multi_reduction <add>, %49, %cst_23 [0] : vector<8x8xf32> to vector<8xf32>
      %51 = vector.shape_cast %50 : vector<8xf32> to vector<1x8xf32>
      %52 = arith.addf %46, %51 : vector<1x8xf32>
      %c0_24 = arith.constant 0 : index
      %c0_25 = arith.constant 0 : index
      %53 = vector.load %arg8[%c0_24, %c0_25] : memref<1x8xf32, #tpu.memory_space<vmem>>, vector<1x8xf32>
      tpu.vector_store %arg8[%c0_24, %c0_25], %52 {strides = array<i32>} : memref<1x8xf32, #tpu.memory_space<vmem>>, vector<1x8xf32>,
      %c0_26 = arith.constant 0 : index
      %c0_27 = arith.constant 0 : index
      %54 = vector.load %arg7[%c0_26, %c0_27] : memref<1x8xf32, #tpu.memory_space<vmem>>, vector<1x8xf32>
      tpu.vector_store %arg7[%c0_26, %c0_27], %42 {strides = array<i32>} : memref<1x8xf32, #tpu.memory_space<vmem>>, vector<1x8xf32>,
    } else {
    }
    %34 = arith.extui %30 : i1 to i32
    %c0_i32_15 = arith.constant 0 : i32
    %35 = arith.cmpi ne, %34, %c0_i32_15 : i32
    scf.if %35 {
      %c8_i32_18 = arith.constant 8 : i32
      %39 = arith.muli %arg0, %c8_i32_18 : i32
      %40 = tpu.iota {dimensions = array<i32: 1>} : vector<8x8xi32>
      %41 = vector.broadcast %39 : i32 to vector<8x8xi32>
      %42 = arith.addi %41, %40 : vector<8x8xi32>
      %c8_i32_19 = arith.constant 8 : i32
      %43 = arith.muli %arg1, %c8_i32_19 : i32
      %44 = tpu.iota {dimensions = array<i32: 0>} : vector<8x8xi32>
      %45 = vector.broadcast %43 : i32 to vector<8x8xi32>
      %46 = arith.addi %45, %44 : vector<8x8xi32>
      %c4_i32 = arith.constant 4 : i32
      %47 = vector.broadcast %c4_i32 : i32 to vector<8x8xi32>
      %48 = arith.cmpi slt, %42, %47 : vector<8x8xi32>
      %c4_i32_20 = arith.constant 4 : i32
      %49 = vector.broadcast %c4_i32_20 : i32 to vector<8x8xi32>
      %50 = arith.addi %42, %49 : vector<8x8xi32>
      %c4_i32_21 = arith.constant 4 : i32
      %51 = vector.broadcast %c4_i32_21 : i32 to vector<8x8xi32>
      %52 = arith.subi %42, %51 : vector<8x8xi32>
      %53 = arith.select %48, %50, %52 : vector<8x8xi1>, vector<8x8xi32>
      %54 = arith.cmpi eq, %46, %53 : vector<8x8xi32>
      %55 = arith.cmpi eq, %46, %42 : vector<8x8xi32>
      %cst_22 = arith.constant 2.000000e+00 : f32
      %56 = vector.broadcast %cst_22 : f32 to vector<8x8xf32>
      %57 = arith.mulf %11, %56 : vector<8x8xf32>
      %58 = arith.select %54, %57, %16 : vector<8x8xi1>, vector<8x8xf32>
      %c0_23 = arith.constant 0 : index
      %c0_24 = arith.constant 0 : index
      %59 = vector.load %arg9[%c0_23, %c0_24] : memref<1x8xf32, #tpu.memory_space<vmem>>, vector<1x8xf32>
      %cst_25 = arith.constant 0.000000e+00 : f32
      %60 = vector.broadcast %cst_25 : f32 to vector<8x8xf32>
      %61 = arith.select %54, %11, %60 : vector<8x8xi1>, vector<8x8xf32>
      %cst_26 = arith.constant dense<0.000000e+00> : vector<8xf32>
      %62 = vector.multi_reduction <add>, %61, %cst_26 [0] : vector<8x8xf32> to vector<8xf32>
      %63 = vector.shape_cast %62 : vector<8xf32> to vector<1x8xf32>
      %cst_27 = arith.constant 2.000000e+00 : f32
      %64 = vector.broadcast %cst_27 : f32 to vector<1x8xf32>
      %65 = arith.mulf %63, %64 : vector<1x8xf32>
      %66 = arith.addf %59, %65 : vector<1x8xf32>
      %c0_28 = arith.constant 0 : index
      %c0_29 = arith.constant 0 : index
      %67 = vector.load %arg9[%c0_28, %c0_29] : memref<1x8xf32, #tpu.memory_space<vmem>>, vector<1x8xf32>
      tpu.vector_store %arg9[%c0_28, %c0_29], %66 {strides = array<i32>} : memref<1x8xf32, #tpu.memory_space<vmem>>, vector<1x8xf32>,
      %cst_30 = arith.constant 0xFF800000 : f32
      %68 = vector.broadcast %cst_30 : f32 to vector<8x8xf32>
      %69 = arith.select %55, %68, %58 : vector<8x8xi1>, vector<8x8xf32>
      %c0_31 = arith.constant 0 : index
      %c0_32 = arith.constant 0 : index
      %70 = vector.load %arg7[%c0_31, %c0_32] : memref<1x8xf32, #tpu.memory_space<vmem>>, vector<1x8xf32>
      %cst_33 = arith.constant dense<0xFF800000> : vector<8xf32>
      %71 = vector.multi_reduction <maximumf>, %69, %cst_33 [0] : vector<8x8xf32> to vector<8xf32>
      %72 = vector.shape_cast %71 : vector<8xf32> to vector<1x8xf32>
      %73 = arith.maximumf %70, %72 : vector<1x8xf32>
      %74 = arith.subf %70, %73 : vector<1x8xf32>
      %75 = math.exp %74 : vector<1x8xf32>
      %c0_34 = arith.constant 0 : index
      %c0_35 = arith.constant 0 : index
      %76 = vector.load %arg8[%c0_34, %c0_35] : memref<1x8xf32, #tpu.memory_space<vmem>>, vector<1x8xf32>
      %77 = arith.mulf %75, %76 : vector<1x8xf32>
      %78 = vector.broadcast %73 : vector<1x8xf32> to vector<8x8xf32>
      %79 = arith.subf %69, %78 : vector<8x8xf32>
      %80 = math.exp %79 : vector<8x8xf32>
      %cst_36 = arith.constant dense<0.000000e+00> : vector<8xf32>
      %81 = vector.multi_reduction <add>, %80, %cst_36 [0] : vector<8x8xf32> to vector<8xf32>
      %82 = vector.shape_cast %81 : vector<8xf32> to vector<1x8xf32>
      %83 = arith.addf %77, %82 : vector<1x8xf32>
      %c0_37 = arith.constant 0 : index
      %c0_38 = arith.constant 0 : index
      %84 = vector.load %arg8[%c0_37, %c0_38] : memref<1x8xf32, #tpu.memory_space<vmem>>, vector<1x8xf32>
      tpu.vector_store %arg8[%c0_37, %c0_38], %83 {strides = array<i32>} : memref<1x8xf32, #tpu.memory_space<vmem>>, vector<1x8xf32>,
      %c0_39 = arith.constant 0 : index
      %c0_40 = arith.constant 0 : index
      %85 = vector.load %arg7[%c0_39, %c0_40] : memref<1x8xf32, #tpu.memory_space<vmem>>, vector<1x8xf32>
      tpu.vector_store %arg7[%c0_39, %c0_40], %73 {strides = array<i32>} : memref<1x8xf32, #tpu.memory_space<vmem>>, vector<1x8xf32>,
    } else {
    }
    %c0_i32_16 = arith.constant 0 : i32
    %36 = arith.cmpi eq, %arg1, %c0_i32_16 : i32
    %37 = arith.extui %36 : i1 to i32
    %c0_i32_17 = arith.constant 0 : i32
    %38 = arith.cmpi ne, %37, %c0_i32_17 : i32
    scf.if %38 {
      %c0_18 = arith.constant 0 : index
      %c0_19 = arith.constant 0 : index
      %39 = vector.load %arg7[%c0_18, %c0_19] : memref<1x8xf32, #tpu.memory_space<vmem>>, vector<1x8xf32>
      %c0_20 = arith.constant 0 : index
      %c0_21 = arith.constant 0 : index
      %40 = vector.load %arg8[%c0_20, %c0_21] : memref<1x8xf32, #tpu.memory_space<vmem>>, vector<1x8xf32>
      %41 = math.log %40 : vector<1x8xf32>
      %42 = arith.addf %39, %41 : vector<1x8xf32>
      %c0_22 = arith.constant 0 : index
      %c0_23 = arith.constant 0 : index
      %43 = vector.load %arg9[%c0_22, %c0_23] : memref<1x8xf32, #tpu.memory_space<vmem>>, vector<1x8xf32>
      %44 = arith.subf %42, %43 : vector<1x8xf32>
      %c0_24 = arith.constant 0 : index
      %c0_25 = arith.constant 0 : index
      %45 = vector.load %arg6[%c0_24, %c0_25] : memref<1x8xf32, #tpu.memory_space<vmem>>, vector<1x8xf32>
      tpu.vector_store %arg6[%c0_24, %c0_25], %44 {strides = array<i32>} : memref<1x8xf32, #tpu.memory_space<vmem>>, vector<1x8xf32>,
    } else {
    }
    return
  }
  func.func @transform_0(%arg0: i32, %arg1: i32) -> (i32, i32) {
    %c0_i32 = arith.constant 0 : i32
    %c0_i32_0 = arith.constant 0 : i32
    return %arg0, %c0_i32 : i32, i32
  }
  func.func @transform_1(%arg0: i32, %arg1: i32) -> (i32, i32) {
    %c0_i32 = arith.constant 0 : i32
    %c0_i32_0 = arith.constant 0 : i32
    %c0_i32_1 = arith.constant 0 : i32
    return %c0_i32, %c0_i32_0 : i32, i32
  }
  func.func @transform_2(%arg0: i32, %arg1: i32) -> (i32, i32) {
    %c0_i32 = arith.constant 0 : i32
    %c0_i32_0 = arith.constant 0 : i32
    return %arg0, %c0_i32 : i32, i32
  }
  func.func @transform_3(%arg0: i32, %arg1: i32) -> (i32, i32) {
    %c0_i32 = arith.constant 0 : i32
    %c0_i32_0 = arith.constant 0 : i32
    %c0_i32_1 = arith.constant 0 : i32
    return %c0_i32, %c0_i32_0 : i32, i32
  }
  func.func @transform_4(%arg0: i32, %arg1: i32) -> (i32, i32) {
    %c0_i32 = arith.constant 0 : i32
    %c0_i32_0 = arith.constant 0 : i32
    return %c0_i32, %arg0 : i32, i32
  }
}

</mosaic_0001>

<bundles_post_ra>
// kernel: tpu_custom_call.1
= control target key start
LH: loop header
LB: loop body
LE: loop exit
PB: predicated region body
PF: predicated region fallthrough
CT: control target
= control target key end

     0   :  { %9 = vsyncpa [#allocation6], 0  ;;  %s489_s0 = inlined_call_operand.hbm [shape: bf16[8,32], index: 0, kind: input, shape index: {}]   ;;  %s490_s1 = inlined_call_operand.hbm [shape: bf16[8,32], index: 1, kind: input, shape index: {}]   ;;  %s491_s2 = inlined_call_operand.hbm [shape: bf16[8,16], index: 2, kind: input, shape index: {}]   ;;  %s492_s3 = inlined_call_operand.vmem [shape: bf16[8,16], index: 3, kind: input, shape index: {}]   ;;  %s493_s4 = inlined_call_operand.hbm [shape: f32[1,8], index: 4, kind: output, shape index: {}]  }
   0x1   :  { %10 = vsyncpa [#allocation9], 0 }
   0x2   :  { %11 = vsyncpa [#allocation7], 0  ;;  %s430_s15 = smov [#allocation8]   ;;  %s431_s17 = smov [#allocation5]  }
   0x3   :  { %s28_s16 = sshll.u32 %s430_s15, 4  ;;  %s18_s18 = sshll.u32 %s431_s17, 4  ;;  %s29_s16 = int_to_ptr.vmem [resolvable:$true] %s28_s16  ;;  %s19_s18 = int_to_ptr.vmem [resolvable:$true] %s18_s18 }
   0x4   :  { %s352_s19 = scalar_lea.vmem %s29_s16, 64  ;;  %p357_p1 = scmp.lt.s32.totalorder %s29_s16, %s29_s16 }
   0x5   :  { %p353_p0 = scmp.ne.s32.totalorder %s29_s16, %s352_s19  ;;  %p358_p2 = scmp.lt.s32.totalorder %s352_s19, %s352_s19 }
   0x7   :  { %p359_p3 = por %p358_p2, %p357_p1 }
   0x9   :  { %p360_p4 = pnand %p359_p3, %p353_p0 }
   0xb   :  { %363 = shalt.err (!%p360_p4)
}
   0xc   :  { %31 = dma.hbm_to_vmem [thread:$0]  %s490_s1, 64, %s29_s16, [#allocation9]  }
   0xd   :  { %s372_s22 = scalar_lea.vmem %s19_s18, 64  ;;  %p377_p6 = scmp.lt.s32.totalorder %s19_s18, %s19_s18 }
   0xe   :  { %p373_p5 = scmp.ne.s32.totalorder %s19_s18, %s372_s22  ;;  %p378_p7 = scmp.lt.s32.totalorder %s372_s22, %s372_s22 }
  0x10   :  { %p379_p8 = por %p378_p7, %p377_p6 }
  0x12   :  { %p380_p9 = pnand %p379_p8, %p373_p5 }
  0x14   :  { %383 = shalt.err (!%p380_p9)
}
  0x15   :  { %21 = dma.hbm_to_vmem [thread:$0]  %s489_s0, 64, %s19_s18, [#allocation6]  }
  0x16   :  { %s432_s25 = smov [#allocation10]  }
  0x17   :  { %s38_s26 = sshll.u32 %s432_s25, 4  ;;  %s39_s26 = int_to_ptr.vmem [resolvable:$true] %s38_s26 }
  0x18   :  { %s392_s27 = scalar_lea.vmem %s39_s26, 64  ;;  %p397_p11 = scmp.lt.s32.totalorder %s39_s26, %s39_s26 }
  0x19   :  { %p393_p10 = scmp.ne.s32.totalorder %s39_s26, %s392_s27  ;;  %p398_p12 = scmp.lt.s32.totalorder %s392_s27, %s392_s27 }
  0x1b   :  { %p399_p13 = por %p398_p12, %p397_p11 }
  0x1d   :  { %p400_p0 = pnand %p399_p13, %p393_p10 }
  0x1f   :  { %403 = shalt.err (!%p400_p0)
}
  0x20   :  { %41 = dma.hbm_to_vmem [thread:$0]  %s491_s2, 64, %s39_s26, [#allocation9]  }
  0x21   :  { %424 = dma.done.wait [#allocation6], 64  }
  0x22   :  { %425 = vsyncadd [#allocation6], 4294967232 }
  0x23   :  { %426 = dma.done.wait [#allocation9], 128  }
  0x24   :  { %427 = vsyncadd [#allocation9], 4294967168  ;;  %v433_v0 = vmov 0.0   ;;  %vm434_vm0 = vmmov 0   ;;  %vm120_vm1 = vcmask 130048   ;;  %vm73_vm2 = vcmask 261120  }
  0x25   :  { %323 = vmatprep.subr.bf16.mxu1 %v433_v0  ;;  %325 = vmatprep.mubr.msk.bf16.mxu1 %vm434_vm0, %v433_v0  ;;  %v63_v1 = vld [vmem:[#allocation10] sm:$0xf]  ;;  %v62_v2 = vld [vmem:[#allocation5] sm:$0xf]  ;;  %v69_v6 = vld [vmem:[#allocation8] sm:$0xf]  ;;  %v176_v8 = vlaneseq }
  0x26   :  { %317 = vmatprep.subr.bf16.mxu0 %v433_v0  ;;  %319 = vmatprep.mubr.msk.bf16.mxu0 %vm434_vm0, %v433_v0  ;;  %v125_v3 = vsel %vm120_vm1, %v63_v1, 0  ;;  %v78_v4 = vsel %vm73_vm2, %v62_v2, 0  ;;  %v72_v5 = vld [vmem:[%s492_s3] sm:$0xf]  ;;  %vm58_vm3 = vcmask 57344   ;;  %v435_v7 = vmov -inf  }
  0x27   :  { %324 = vmatpush3.bf16.xpose.msra.mxu1 %v125_v3  ;;  %318 = vmatpush3.bf16.xpose.msra.mxu0 %v78_v4  ;;  %59 = vst.msk [vmem:[#allocation2] sm:$0x1] %vm58_vm3, %v435_v7  ;;  %60 = vst.msk [vmem:[#allocation3] sm:$0x1] %vm58_vm3, %v433_v0  ;;  %v177_v9 = vand.u32 127, %v176_v8  ;;  %v181_v12 = vshrl.u32 %v176_v8, 7 }
  0x28   :  { %61 = vst.msk [vmem:[#allocation4] sm:$0x1] %vm58_vm3, %v433_v0  ;;  %vm194_vm6 = vcmask 64512   ;;  %s436_s3 = smov [#allocation11]  }
  0x29   :  { %v185_v10 = vadd.s32 4, %v177_v9  ;;  %v312_v11 = vadd.s32 4294967292, %v177_v9  ;;  %vm184_vm4 = vcmp.lt.s32.totalorder %v177_v9, 4  ;;  %vm189_vm7 = vcmp.eq.s32.totalorder %v181_v12, %v177_v9  ;;  %s296_s29 = sshll.u32 %s436_s3, 4  ;;  %s297_s29 = int_to_ptr.vmem [resolvable:$true] %s296_s29 }
  0x2a   :  { %v224_v47 = vsub.s32 0, %v181_v12  ;;  %s404_s30 = scalar_lea.vmem %s297_s29, 16  ;;  %s408_s5 = scalar_lea.vmem %s297_s29, 32 }
  0x2b   :  { %v187_v13 = vsel %vm184_vm4, %v185_v10, %v312_v11  ;;  %p405_p1 = scmp.ne.s32.totalorder %s297_s29, %s404_s30  ;;  %p409_p2 = scmp.lt.s32.totalorder %s297_s29, %s297_s29 }
  0x2c   :  { %vm188_vm5 = vcmp.eq.s32.totalorder %v181_v12, %v187_v13  ;;  %p410_p3 = scmp.lt.s32.totalorder %s408_s5, %s404_s30 }
  0x2e   :  { %326 = vmatmul.mubr.msk.bf16.vlgmr.msra.gmra.mxu1 %vm120_vm1, %v72_v5  ;;  %320 = vmatmul.mubr.msk.bf16.vlgmr.msra.gmra.mxu0 %vm73_vm2, %v69_v6  ;;  %v207_v45 = vld [vmem:[#allocation2] sm:$0x1]  ;;  %v219_v61 = vld [vmem:[#allocation3] sm:$0x1]  ;;  %p411_p4 = por %p410_p3, %p409_p2 }
  0x2f   :  { %v192_v31 = vld [vmem:[#allocation4] sm:$0x1] }
  0x30   :  { %p412_p5 = pnand %p411_p4, %p405_p1 }
  0xee   :  { %v161_v14 = vpop.f32.mrf.mxu1  ;;  %v114_v15 = vpop.f32.mrf.mxu0 }
  0xef   :  { %v167_v16 = vmax.f32 %v161_v14, 0.5  ;;  %v193_v17 = vsel %vm188_vm5, %v114_v15, 0.0  ;;  %v190_v32 = vmul.f32 2.0, %v114_v15 }
  0xf0   :  { %v327_v18 = vpop.f32.mrf.mxu1  ;;  %v195_v19 = vsel %vm194_vm6, %v193_v17, 0.0  ;;  %v321_v20 = vpop.f32.mrf.mxu0 }
  0xf1   :  { %336 = vrcp.f32 %v167_v16  ;;  %v196_v21 = vrot.slane %v195_v19, 4 }
  0xf2   :  { %v164_v22 = vpop.f32.mrf.mxu1  ;;  %v117_v23 = vpop.f32.mrf.mxu0 }
  0xf3   :  { %v197_v24 = vadd.f32 %v196_v21, %v195_v19 }
  0xf4   :  { %v328_v25 = vpop.f32.mrf.mxu1  ;;  %v322_v26 = vpop.f32.mrf.mxu0 }
  0xf5   :  { %v198_v27 = vrot.slane %v197_v24, 2 }
  0xf7   :  { %v199_v28 = vadd.f32 %v198_v27, %v197_v24 }
  0xf9   :  { %v200_v29 = vrot.slane %v199_v28, 1 }
  0xfb   :  { %v201_v30 = vadd.f32 %v200_v29, %v199_v28 }
  0xfd   :  { %v202_v33 = vmul.f32 2.0, %v201_v30 }
  0xfe   :  { %v337_v34 = vpop.eup %336 }
  0xff   :  { %v169_v35 = vmul.f32 %v337_v34, %v114_v15  ;;  %v203_v36 = vadd.f32 %v202_v33, %v192_v31 }
 0x101   :  { %v191_v37 = vsel %vm188_vm5, %v190_v32, %v169_v35  ;;  %205 = vst.msk [vmem:[#allocation4] sm:$0x1] %vm58_vm3, %v203_v36 }
 0x102   :  { %v206_v38 = vsel %vm189_vm7, -inf, %v191_v37 }
 0x103   :  { %v208_v39 = vsel %vm194_vm6, %v206_v38, -inf }
 0x104   :  { %v209_v40 = vrot.slane %v208_v39, 4 }
 0x106   :  { %v210_v41 = vmax.f32 %v208_v39, %v209_v40 }
 0x108   :  { %v211_v42 = vrot.slane %v210_v41, 2  ;;  %v286_v7 = vld [vmem:[#allocation4] sm:$0x1] }
 0x10a   :  { %v212_v43 = vmax.f32 %v210_v41, %v211_v42 }
 0x10c   :  { %v213_v44 = vrot.slane %v212_v43, 1 }
 0x10e   :  { %v214_v46 = vmax.f32 %v212_v43, %v213_v44 }
 0x110   :  { %v215_v48 = vmax.f32 %v207_v45, %v214_v46 }
 0x112   :  { %v225_v49 = vrot.slane %v215_v48, %v224_v47  ;;  %239 = vst.msk [vmem:[#allocation2] sm:$0x1] %vm58_vm3, %v215_v48  ;;  %v216_v52 = vsub.f32 %v207_v45, %v215_v48 }
 0x114   :  { %v227_v50 = vsub.f32 %v206_v38, %v225_v49  ;;  %v217_v53 = vmul.f32 1.442695, %v216_v52 }
 0x116   :  { %v228_v51 = vmul.f32 1.442695, %v227_v50 }
 0x118   :  { %338 = vpow2.f32 %v228_v51 }
 0x119   :  { %340 = vpow2.f32 %v217_v53  ;;  %v281_v5 = vld [vmem:[#allocation2] sm:$0x1] }
 0x125   :  { %v339_v54 = vpop.eup %338 }
 0x126   :  { %v230_v55 = vsel %vm194_vm6, %v339_v54, 0.0  ;;  %v341_v60 = vpop.eup %340 }
 0x127   :  { %v231_v56 = vrot.slane %v230_v55, 4  ;;  %v220_v63 = vmul.f32 %v341_v60, %v219_v61 }
 0x129   :  { %v232_v57 = vadd.f32 %v231_v56, %v230_v55 }
 0x12b   :  { %v233_v58 = vrot.slane %v232_v57, 2 }
 0x12d   :  { %v234_v59 = vadd.f32 %v233_v58, %v232_v57 }
 0x12f   :  { %v235_v62 = vrot.slane %v234_v59, 1 }
 0x131   :  { %v236_v0 = vadd.f32 %v235_v62, %v234_v59 }
 0x133   :  { %v237_v1 = vadd.f32 %v236_v0, %v220_v63 }
 0x135   :  { %238 = vst.msk [vmem:[#allocation3] sm:$0x1] %vm58_vm3, %v237_v1 }
 0x13c   :  { %v282_v2 = vld [vmem:[#allocation3] sm:$0x1] }
 0x13d   :  { %342 = vlog2.f32 %v282_v2 }
 0x14a   :  { %v343_v3 = vpop.eup %342 }
 0x14b   :  { %v284_v4 = vmul.f32 0.6931472, %v343_v3 }
 0x14d   :  { %v285_v6 = vadd.f32 %v284_v4, %v281_v5 }
 0x14f   :  { %v287_v8 = vsub.f32 %v285_v6, %v286_v7 }
 0x151   :  { %289 = vst.msk [vmem:[#allocation11] sm:$0x1] %vm58_vm3, %v287_v8 }
 0x152   :  { %415 = shalt.err (!%p412_p5)
}
 0x153   :  { %299 = dma.vmem_to_hbm [thread:$0]  %s297_s29, 16, %s493_s4, [#allocation7]  }
 0x154   :  { %428 = dma.done.wait [#allocation7], 16  }
 0x155   :  { %429 = vsyncadd [#allocation7], 4294967280 }
 0x156   :  { %303 = vsyncpa [#allocation6], 1 }
 0x157   :  { %304 = vsyncpa [#allocation9], 1 }
 0x158   :  { %305 = vsyncpa [#allocation7], 1 }

</bundles_post_ra>
